<compile_context>
chip_gen: v7x
topology: tpu7x:2x2x1
jax: 0.10.0
libtpu: 0.0.40
codegen_flags: <defaults>
</compile_context>

<pallas_src>
import jax
import jax.numpy as jnp
from jax.experimental import pallas as pl
from jax.experimental.pallas import tpu as pltpu


def _rmse_loss_kernel(yt_ref, yp_ref, loss1_ref, loss2_ref):
    # yt_ref / yp_ref : (TILE_R, L) in VMEM
    x = yt_ref[...].astype(jnp.float32)
    y = yp_ref[...].astype(jnp.float32)
    L = x.shape[-1]
    inv_L = jnp.float32(1.0 / L)

    # loss1 = mean((y_true - y_pred)^2, axis=-1), nan_to_num
    # (kept in the numerically safe diff form).
    diff = x - y
    loss1 = jnp.sum(diff * diff, axis=-1, keepdims=True) * inv_L     # (TILE_R, 1)
    loss1 = jnp.nan_to_num(loss1)

    # pearson_correlation with torch semantics:
    #   unbiased variance (ddof=1); denominator uses L * std_x * std_y.
    # One rsqrt on the variance product instead of two sqrt + a divide (EUP).
    x_mean = jnp.sum(x, axis=-1, keepdims=True) * inv_L
    y_mean = jnp.sum(y, axis=-1, keepdims=True) * inv_L
    xc = x - x_mean
    yc = y - y_mean
    inv_nm1 = jnp.float32(1.0 / (L - 1))
    x_var = jnp.sum(xc * xc, axis=-1, keepdims=True) * inv_nm1       # (TILE_R, 1)
    y_var = jnp.sum(yc * yc, axis=-1, keepdims=True) * inv_nm1
    num = jnp.sum(xc * yc, axis=-1, keepdims=True)
    r = num * jax.lax.rsqrt(x_var * y_var) * inv_L
    r = jnp.nan_to_num(r)                                            # 0/0 -> 0

    loss1_ref[...] = loss1                                           # (TILE_R, 1)
    loss2_ref[...] = r                                               # (TILE_R, 1)


def _round_up(x, m):
    return ((x + m - 1) // m) * m


def _choose_tile_r(R, L):
    # 2 inputs x 2 pipeline buffers of (TILE_R, L) f32 must stay well under the
    # smallest default scoped-VMEM budget (16 MiB on v5e; 32 MiB v6e/v7x).
    budget_bytes = 8 * 1024 * 1024
    max_rows = budget_bytes // (4 * L * 4)      # 4 buffers x 4 B/elem
    max_rows = max(8, (max_rows // 8) * 8)
    tile_r = min(_round_up(R, 8), max_rows, 1024)
    return max(tile_r, 8)


def rmse_loss(y_true, y_pred):
    B, C, L = y_true.shape
    R = B * C

    x = y_true.reshape(R, L).astype(jnp.float32)
    y = y_pred.reshape(R, L).astype(jnp.float32)

    tile_r = _choose_tile_r(R, L)
    num_tiles = pl.cdiv(R, tile_r)
    R_pad = num_tiles * tile_r
    if R_pad != R:
        # Zero-padded rows are dropped again below ([:R]); values irrelevant.
        x = jnp.pad(x, ((0, R_pad - R), (0, 0)))
        y = jnp.pad(y, ((0, R_pad - R), (0, 0)))

    loss1_rows, loss2_rows = pl.pallas_call(
        _rmse_loss_kernel,
        out_shape=(
            jax.ShapeDtypeStruct((R_pad, 1), jnp.float32),
            jax.ShapeDtypeStruct((R_pad, 1), jnp.float32),
        ),
        grid_spec=pltpu.PrefetchScalarGridSpec(
            num_scalar_prefetch=0,
            grid=(num_tiles,),
            in_specs=[
                pl.BlockSpec((tile_r, L), lambda i: (i, 0)),
                pl.BlockSpec((tile_r, L), lambda i: (i, 0)),
            ],
            out_specs=(
                pl.BlockSpec((tile_r, 1), lambda i: (i, 0)),
                pl.BlockSpec((tile_r, 1), lambda i: (i, 0)),
            ),
        ),
        compiler_params=pltpu.CompilerParams(
            dimension_semantics=("parallel",),
        ),
    )(x, y)

    # Glue: tiny scalar reductions over the R valid rows (few microseconds).
    loss1_rows = loss1_rows[:R, 0]
    loss2_rows = loss2_rows[:R, 0]
    loss = loss1_rows - jnp.float32(0.1) * loss2_rows
    out_main = jnp.mean(loss)          # == mean(mean(loss, axis=1)) for (B, C)
    out_pearson = jnp.mean(loss2_rows)
    out_mse = jnp.mean(loss1_rows)
    return out_main, out_pearson, out_mse


def _reference(y_true, y_pred):
    # Pure-JAX mirror of the PyTorch forward (sanity check).
    L = y_true.shape[-1]
    loss1 = jnp.nan_to_num(jnp.mean(jnp.square(y_true - y_pred), axis=2))
    xm = jnp.mean(y_true, axis=2, keepdims=True)
    ym = jnp.mean(y_pred, axis=2, keepdims=True)
    xv = jnp.var(y_true, axis=2, ddof=1)
    yv = jnp.var(y_pred, axis=2, ddof=1)
    r = jnp.sum((y_true - xm) * (y_pred - ym), axis=2)
    r = jnp.nan_to_num(r / (L * jnp.sqrt(xv) * jnp.sqrt(yv)))
    loss = loss1 - 0.1 * r
    return jnp.mean(jnp.mean(loss, axis=1)), jnp.mean(r), jnp.mean(loss1)


if __name__ == "__main__":
    key = jax.random.PRNGKey(0)
    k1, k2 = jax.random.split(key)
    B, C, L = 2, 4, 128
    y_true = jax.random.normal(k1, (B, C, L), dtype=jnp.float32)
    y_pred = y_true + 0.3 * jax.random.normal(k2, (B, C, L), dtype=jnp.float32)

    out = jax.jit(rmse_loss)(y_true, y_pred)
    out = jax.block_until_ready(out)

    ref = _reference(y_true, y_pred)
    for a, b in zip(out, ref):
        assert jnp.allclose(a, b, rtol=1e-5, atol=1e-5), (a, b)

    print("KERNEL_OK")
</pallas_src>

<mosaic_0001>
module attributes {stable_mosaic.version = 11 : i64} {
  func.func @_rmse_loss_kernel(%arg0: i32, %arg1: memref<8x128xf32, #tpu.memory_space<vmem>>, %arg2: memref<8x128xf32, #tpu.memory_space<vmem>>, %arg3: memref<8x1xf32, #tpu.memory_space<vmem>>, %arg4: memref<8x1xf32, #tpu.memory_space<vmem>>) attributes {dimension_semantics = [#tpu.dimension_semantics<parallel>], iteration_bounds = array<i64: 1>, scalar_prefetch = 0 : i64, scratch_operands = 0 : i64, tpu.core_type = #tpu.core_type<tc>, window_params = [{transform_indices = @transform_0, window_bounds = array<i64: 8, 128>}, {transform_indices = @transform_1, window_bounds = array<i64: 8, 128>}, {transform_indices = @transform_2, window_bounds = array<i64: 8, 1>}, {transform_indices = @transform_3, window_bounds = array<i64: 8, 1>}]} {
    %c0 = arith.constant 0 : index
    %c0_0 = arith.constant 0 : index
    %0 = vector.load %arg1[%c0, %c0_0] : memref<8x128xf32, #tpu.memory_space<vmem>>, vector<8x128xf32>
    %c0_1 = arith.constant 0 : index
    %c0_2 = arith.constant 0 : index
    %1 = vector.load %arg2[%c0_1, %c0_2] : memref<8x128xf32, #tpu.memory_space<vmem>>, vector<8x128xf32>
    %2 = arith.subf %0, %1 : vector<8x128xf32>
    %3 = arith.mulf %2, %2 : vector<8x128xf32>
    %cst = arith.constant dense<0.000000e+00> : vector<8xf32>
    %4 = vector.multi_reduction <add>, %3, %cst [1] : vector<8x128xf32> to vector<8xf32>
    %5 = vector.shape_cast %4 : vector<8xf32> to vector<8x1xf32>
    %cst_3 = arith.constant 7.812500e-03 : f32
    %6 = vector.broadcast %cst_3 : f32 to vector<8x1xf32>
    %7 = arith.mulf %5, %6 : vector<8x1xf32>
    %8 = arith.cmpf one, %7, %7 : vector<8x1xf32>
    %cst_4 = arith.constant 0.000000e+00 : f32
    %9 = vector.broadcast %cst_4 : f32 to vector<8x1xf32>
    %10 = arith.select %8, %9, %7 : vector<8x1xi1>, vector<8x1xf32>
    %cst_5 = arith.constant 0x7F800000 : f32
    %11 = vector.broadcast %cst_5 : f32 to vector<8x1xf32>
    %12 = arith.cmpf oeq, %10, %11 : vector<8x1xf32>
    %cst_6 = arith.constant 3.40282347E+38 : f32
    %13 = vector.broadcast %cst_6 : f32 to vector<8x1xf32>
    %14 = arith.select %12, %13, %10 : vector<8x1xi1>, vector<8x1xf32>
    %cst_7 = arith.constant 0xFF800000 : f32
    %15 = vector.broadcast %cst_7 : f32 to vector<8x1xf32>
    %16 = arith.cmpf oeq, %14, %15 : vector<8x1xf32>
    %cst_8 = arith.constant -3.40282347E+38 : f32
    %17 = vector.broadcast %cst_8 : f32 to vector<8x1xf32>
    %18 = arith.select %16, %17, %14 : vector<8x1xi1>, vector<8x1xf32>
    %cst_9 = arith.constant dense<0.000000e+00> : vector<8xf32>
    %19 = vector.multi_reduction <add>, %0, %cst_9 [1] : vector<8x128xf32> to vector<8xf32>
    %20 = vector.shape_cast %19 : vector<8xf32> to vector<8x1xf32>
    %cst_10 = arith.constant 7.812500e-03 : f32
    %21 = vector.broadcast %cst_10 : f32 to vector<8x1xf32>
    %22 = arith.mulf %20, %21 : vector<8x1xf32>
    %cst_11 = arith.constant dense<0.000000e+00> : vector<8xf32>
    %23 = vector.multi_reduction <add>, %1, %cst_11 [1] : vector<8x128xf32> to vector<8xf32>
    %24 = vector.shape_cast %23 : vector<8xf32> to vector<8x1xf32>
    %cst_12 = arith.constant 7.812500e-03 : f32
    %25 = vector.broadcast %cst_12 : f32 to vector<8x1xf32>
    %26 = arith.mulf %24, %25 : vector<8x1xf32>
    %27 = vector.broadcast %22 : vector<8x1xf32> to vector<8x128xf32>
    %28 = arith.subf %0, %27 : vector<8x128xf32>
    %29 = vector.broadcast %26 : vector<8x1xf32> to vector<8x128xf32>
    %30 = arith.subf %1, %29 : vector<8x128xf32>
    %31 = arith.mulf %28, %28 : vector<8x128xf32>
    %cst_13 = arith.constant dense<0.000000e+00> : vector<8xf32>
    %32 = vector.multi_reduction <add>, %31, %cst_13 [1] : vector<8x128xf32> to vector<8xf32>
    %33 = vector.shape_cast %32 : vector<8xf32> to vector<8x1xf32>
    %cst_14 = arith.constant 0.00787401571 : f32
    %34 = vector.broadcast %cst_14 : f32 to vector<8x1xf32>
    %35 = arith.mulf %33, %34 : vector<8x1xf32>
    %36 = arith.mulf %30, %30 : vector<8x128xf32>
    %cst_15 = arith.constant dense<0.000000e+00> : vector<8xf32>
    %37 = vector.multi_reduction <add>, %36, %cst_15 [1] : vector<8x128xf32> to vector<8xf32>
    %38 = vector.shape_cast %37 : vector<8xf32> to vector<8x1xf32>
    %cst_16 = arith.constant 0.00787401571 : f32
    %39 = vector.broadcast %cst_16 : f32 to vector<8x1xf32>
    %40 = arith.mulf %38, %39 : vector<8x1xf32>
    %41 = arith.mulf %28, %30 : vector<8x128xf32>
    %cst_17 = arith.constant dense<0.000000e+00> : vector<8xf32>
    %42 = vector.multi_reduction <add>, %41, %cst_17 [1] : vector<8x128xf32> to vector<8xf32>
    %43 = vector.shape_cast %42 : vector<8xf32> to vector<8x1xf32>
    %44 = arith.mulf %35, %40 : vector<8x1xf32>
    %45 = math.rsqrt %44 : vector<8x1xf32>
    %46 = arith.mulf %43, %45 : vector<8x1xf32>
    %cst_18 = arith.constant 7.812500e-03 : f32
    %47 = vector.broadcast %cst_18 : f32 to vector<8x1xf32>
    %48 = arith.mulf %46, %47 : vector<8x1xf32>
    %49 = arith.cmpf one, %48, %48 : vector<8x1xf32>
    %cst_19 = arith.constant 0.000000e+00 : f32
    %50 = vector.broadcast %cst_19 : f32 to vector<8x1xf32>
    %51 = arith.select %49, %50, %48 : vector<8x1xi1>, vector<8x1xf32>
    %cst_20 = arith.constant 0x7F800000 : f32
    %52 = vector.broadcast %cst_20 : f32 to vector<8x1xf32>
    %53 = arith.cmpf oeq, %51, %52 : vector<8x1xf32>
    %cst_21 = arith.constant 3.40282347E+38 : f32
    %54 = vector.broadcast %cst_21 : f32 to vector<8x1xf32>
    %55 = arith.select %53, %54, %51 : vector<8x1xi1>, vector<8x1xf32>
    %cst_22 = arith.constant 0xFF800000 : f32
    %56 = vector.broadcast %cst_22 : f32 to vector<8x1xf32>
    %57 = arith.cmpf oeq, %55, %56 : vector<8x1xf32>
    %cst_23 = arith.constant -3.40282347E+38 : f32
    %58 = vector.broadcast %cst_23 : f32 to vector<8x1xf32>
    %59 = arith.select %57, %58, %55 : vector<8x1xi1>, vector<8x1xf32>
    %c0_24 = arith.constant 0 : index
    %c0_25 = arith.constant 0 : index
    %60 = vector.load %arg3[%c0_24, %c0_25] : memref<8x1xf32, #tpu.memory_space<vmem>>, vector<8x1xf32>
    tpu.vector_store %arg3[%c0_24, %c0_25], %18 {strides = array<i32>} : memref<8x1xf32, #tpu.memory_space<vmem>>, vector<8x1xf32>,
    %c0_26 = arith.constant 0 : index
    %c0_27 = arith.constant 0 : index
    %61 = vector.load %arg4[%c0_26, %c0_27] : memref<8x1xf32, #tpu.memory_space<vmem>>, vector<8x1xf32>
    tpu.vector_store %arg4[%c0_26, %c0_27], %59 {strides = array<i32>} : memref<8x1xf32, #tpu.memory_space<vmem>>, vector<8x1xf32>,
    return
  }
  func.func @transform_0(%arg0: i32) -> (i32, i32) {
    %c0_i32 = arith.constant 0 : i32
    %c0_i32_0 = arith.constant 0 : i32
    return %arg0, %c0_i32 : i32, i32
  }
  func.func @transform_1(%arg0: i32) -> (i32, i32) {
    %c0_i32 = arith.constant 0 : i32
    %c0_i32_0 = arith.constant 0 : i32
    return %arg0, %c0_i32 : i32, i32
  }
  func.func @transform_2(%arg0: i32) -> (i32, i32) {
    %c0_i32 = arith.constant 0 : i32
    %c0_i32_0 = arith.constant 0 : i32
    return %arg0, %c0_i32 : i32, i32
  }
  func.func @transform_3(%arg0: i32) -> (i32, i32) {
    %c0_i32 = arith.constant 0 : i32
    %c0_i32_0 = arith.constant 0 : i32
    return %arg0, %c0_i32 : i32, i32
  }
}

</mosaic_0001>

<bundles_post_ra>
// kernel: rmse_loss.1
= control target key start
LH: loop header
LB: loop body
LE: loop exit
PB: predicated region body
PF: predicated region fallthrough
CT: control target
= control target key end

     0   :  { %9 = vsyncpa [#allocation3], 0  ;;  %s106_s12 = smov [#allocation2]   ;;  %s148_s0 = inlined_call_operand.hbm [shape: f32[8,128], index: 0, kind: input, shape index: {}]   ;;  %s149_s1 = inlined_call_operand.vmem [shape: f32[8,128], index: 1, kind: input, shape index: {}]   ;;  %s150_s2 = inlined_call_operand.vmem [shape: f32[8,1], index: 2, kind: output, shape index: {0}]   ;;  %s151_s3 = inlined_call_operand.vmem [shape: f32[8,1], index: 3, kind: output, shape index: {1}]  }
   0x1   :  { %s16_s13 = sshll.u32 %s106_s12, 4  ;;  %s82_s16 = scalar_lea.hbm %s148_s0, 128  ;;  %s17_s13 = int_to_ptr.vmem [resolvable:$true] %s16_s13 }
   0x2   :  { %p83_p0 = scmp.ne.s32.totalorder %s148_s0, %s82_s16  ;;  %p86_p1 = scmp.lt.u32.totalorder %s82_s16, %s148_s0 }
   0x4   :  { %p88_p2 = pnand %p86_p1, %p83_p0 }
   0x6   :  { %91 = shalt.err (!%p88_p2)
}
   0x7   :  { %s92_s21 = scalar_lea.vmem %s17_s13, 128  ;;  %p97_p4 = scmp.lt.s32.totalorder %s17_s13, %s17_s13 }
   0x8   :  { %p93_p3 = scmp.ne.s32.totalorder %s17_s13, %s92_s21  ;;  %p98_p5 = scmp.lt.s32.totalorder %s92_s21, %s92_s21 }
   0xa   :  { %p99_p6 = por %p98_p5, %p97_p4 }
   0xc   :  { %p100_p7 = pnand %p99_p6, %p93_p3 }
   0xe   :  { %103 = shalt.err (!%p100_p7)
}
   0xf   :  { %19 = dma.hbm_to_vmem [thread:$0]  %s148_s0, 128, %s17_s13, [#allocation3]  }
  0x10   :  { %104 = dma.done.wait [#allocation3], 128  }
  0x11   :  { %105 = vsyncadd [#allocation3], 4294967168  ;;  %v25_v0 = vld [vmem:[#allocation2] sm:$0xff]  ;;  %vm67_vm2 = vcmask 7168  }
  0x12   :  { %38 = vadd.xlane.f32.xlu0 %v25_v0  ;;  %v26_v1 = vld [vmem:[%s149_s1] sm:$0xff] }
  0x13   :  { %v27_v9 = vsub.f32 %v25_v0, %v26_v1 }
  0x15   :  { %v28_v12 = vmul.f32 %v27_v9, %v27_v9 }
  0x16   :  { %41 = vadd.xlane.f32.xlu0 %v26_v1 }
  0x9f   :  { %v39_v2 = vpop.xlane.xlu0 %38 }
  0xa0   :  { %v40_v3 = vmul.f32 0.0078125, %v39_v2 }
  0xa2   :  { %v44_v4 = vsub.f32 %v25_v0, %v40_v3 }
  0xa3   :  { %v42_v5 = vpop.xlane.xlu0 %41 }
  0xa4   :  { %v43_v6 = vmul.f32 0.0078125, %v42_v5  ;;  %v46_v7 = vmul.f32 %v44_v4, %v44_v4 }
  0xa6   :  { %v45_v8 = vsub.f32 %v26_v1, %v43_v6  ;;  %47 = vadd.xlane.f32.xlu1 %v46_v7 }
  0xa8   :  { %v54_v10 = vmul.f32 %v45_v8, %v44_v4  ;;  %v50_v11 = vmul.f32 %v45_v8, %v45_v8 }
  0xaa   :  { %55 = vadd.xlane.f32.xlu0 %v54_v10  ;;  %51 = vadd.xlane.f32.xlu1 %v50_v11 }
  0xae   :  { %29 = vadd.xlane.f32.xlu1 %v28_v12 }
 0x133   :  { %v48_v13 = vpop.xlane.xlu1 %47 }
 0x134   :  { %v49_v15 = vmul.f32 0.007874016, %v48_v13 }
 0x137   :  { %v52_v14 = vpop.xlane.xlu1 %51  ;;  %v56_v24 = vpop.xlane.xlu0 %55 }
 0x138   :  { %v53_v16 = vmul.f32 0.007874016, %v52_v14 }
 0x13a   :  { %v57_v17 = vmul.f32 %v53_v16, %v49_v15 }
 0x13b   :  { %v30_v18 = vpop.xlane.xlu1 %29 }
 0x13c   :  { %80 = vrsqrt.f32 %v57_v17  ;;  %v31_v19 = vmul.f32 0.0078125, %v30_v18 }
 0x13e   :  { %vm32_vm0 = vcmp.ne.f32.partialorder %v31_v19, %v31_v19 }
 0x13f   :  { %v33_v20 = vsel %vm32_vm0, 0.0, %v31_v19 }
 0x140   :  { %vm34_vm1 = vcmp.eq.f32.partialorder %v33_v20, inf }
 0x141   :  { %v35_v21 = vsel %vm34_vm1, 3.4028235e+38, %v33_v20 }
 0x142   :  { %vm36_vm3 = vcmp.eq.f32.partialorder %v35_v21, -inf }
 0x143   :  { %v37_v22 = vsel %vm36_vm3, -3.4028235e+38, %v35_v21 }
 0x144   :  { %68 = vst.msk [vmem:[%s150_s2] sm:$0xff] %vm67_vm2, %v37_v22 }
 0x146   :  { %v81_v23 = vpop.eup %80 }
 0x147   :  { %v59_v25 = vmul.f32 %v81_v23, %v56_v24 }
 0x149   :  { %v60_v26 = vmul.f32 0.0078125, %v59_v25 }
 0x14b   :  { %vm61_vm4 = vcmp.ne.f32.partialorder %v60_v26, %v60_v26 }
 0x14c   :  { %v62_v27 = vsel %vm61_vm4, 0.0, %v60_v26 }
 0x14d   :  { %vm63_vm5 = vcmp.eq.f32.partialorder %v62_v27, inf }
 0x14e   :  { %v64_v28 = vsel %vm63_vm5, 3.4028235e+38, %v62_v27 }
 0x14f   :  { %vm65_vm6 = vcmp.eq.f32.partialorder %v64_v28, -inf }
 0x150   :  { %v66_v29 = vsel %vm65_vm6, -3.4028235e+38, %v64_v28 }
 0x151   :  { %69 = vst.msk [vmem:[%s151_s3] sm:$0xff] %vm67_vm2, %v66_v29 }
 0x152   :  { %78 = vsyncpa [#allocation3], 1 }

</bundles_post_ra>
